<compile_context>
chip_gen: v7x
topology: tpu7x:2x2x1
jax: 0.10.0
libtpu: 0.0.40
codegen_flags: <defaults>
</compile_context>

<pallas_src>
import functools
import math

import jax
import jax.numpy as jnp
from jax.experimental import pallas as pl
from jax.experimental.pallas import tpu as pltpu

_LOG_2PI = math.log(2.0 * math.pi)
_LOG_2 = math.log(2.0)


def _policy_kernel(scales_ref,                      # (2,) SMEM: [log_std_multiplier, log_std_offset]
                   obs_ref, w1_ref, b1_ref, w2_ref, b2_ref, w3_ref, b3_ref, eps_ref,
                   out_ref, *, action_dim):
    x = obs_ref[...]

    # ---- base MLP: two ReLU layers + one fused (d, 2A) head, all on the MXU ----
    h1 = jnp.dot(x, w1_ref[...], preferred_element_type=jnp.float32) + b1_ref[...]
    h1 = jnp.maximum(h1, 0.0)
    h2 = jnp.dot(h1, w2_ref[...], preferred_element_type=jnp.float32) + b2_ref[...]
    h2 = jnp.maximum(h2, 0.0)
    heads = jnp.dot(h2, w3_ref[...], preferred_element_type=jnp.float32) + b3_ref[...]

    mean = heads[:, :action_dim]
    log_std = heads[:, action_dim:]

    # ---- log_std scaling + clamp, std ----
    mult = scales_ref[0]
    off = scales_ref[1]
    log_std = mult * log_std + off
    log_std = jnp.clip(log_std, -20.0, 2.0)
    std = jnp.exp(log_std)

    # ---- reparameterized sample + tanh squash ----
    eps = eps_ref[...]
    z = mean + std * eps
    action = jnp.tanh(z)

    # ---- log prob of TransformedDistribution(Normal, TanhTransform) ----
    # Normal(mean, std).log_prob(z); note (z - mean)/std == eps exactly -> no divide needed.
    normal_lp = -0.5 * (eps * eps) - log_std - 0.5 * _LOG_2PI
    # TanhTransform.log_abs_det_jacobian(z, tanh(z)) = 2*(log 2 - z - softplus(-2z)),
    # with a numerically stable softplus(-2z).
    sp = jnp.log1p(jnp.exp(-2.0 * jnp.abs(z))) + jnp.maximum(-2.0 * z, 0.0)
    log_det = 2.0 * (_LOG_2 - z - sp)
    lp = jnp.sum(normal_lp - log_det, axis=-1, keepdims=True)

    # packed output: [action | log_prob] -> single output DMA stream
    out_ref[...] = jnp.concatenate([action, lp], axis=-1)


def _round_up(x, m):
    return ((x + m - 1) // m) * m


def tanh_gaussian_policy_forward(observations, params, eps, deterministic=False,
                                 block_b=256):
    """Pallas forward.

    observations: (B, obs_dim) f32, eps: (B, action_dim) f32 reparameterization noise.
    Returns (action (B, A), log_prob (B,)).
    """
    B, obs_dim = observations.shape
    A = params["w3"].shape[1] // 2
    if deterministic:
        eps = jnp.zeros_like(eps)

    # Batch tile: 256 rows by default (fills a v6e/v7x 256-wide MXU pass; multiple of 128
    # for v5e).  Small batches just use one rounded-up tile.  Pad B so every tile is full
    # (padded rows are computed and discarded; math is finite for zero inputs).
    tb = block_b if B >= block_b else _round_up(B, 8)
    b_pad = _round_up(B, tb)
    if b_pad != B:
        observations = jnp.pad(observations, ((0, b_pad - B), (0, 0)))
        eps = jnp.pad(eps, ((0, b_pad - B), (0, 0)))
    num_tiles = b_pad // tb

    w1, b1 = params["w1"], params["b1"]
    w2, b2 = params["w2"], params["b2"]
    w3, b3 = params["w3"], params["b3"]
    scales = params["scales"]  # (2,) f32: [log_std_multiplier, log_std_offset]

    kernel = functools.partial(_policy_kernel, action_dim=A)

    out = pl.pallas_call(
        kernel,
        out_shape=jax.ShapeDtypeStruct((b_pad, A + 1), jnp.float32),
        grid_spec=pltpu.PrefetchScalarGridSpec(
            num_scalar_prefetch=1,          # scales -> SMEM, available to index_maps too
            grid=(num_tiles,),
            in_specs=[
                pl.BlockSpec((tb, obs_dim), lambda i, s: (i, 0)),   # obs tile
                pl.BlockSpec(w1.shape, lambda i, s: (0, 0)),        # resident weights/biases
                pl.BlockSpec(b1.shape, lambda i, s: (0, 0)),
                pl.BlockSpec(w2.shape, lambda i, s: (0, 0)),
                pl.BlockSpec(b2.shape, lambda i, s: (0, 0)),
                pl.BlockSpec(w3.shape, lambda i, s: (0, 0)),
                pl.BlockSpec(b3.shape, lambda i, s: (0, 0)),
                pl.BlockSpec((tb, A), lambda i, s: (i, 0)),         # eps tile
            ],
            out_specs=pl.BlockSpec((tb, A + 1), lambda i, s: (i, 0)),
        ),
        compiler_params=pltpu.CompilerParams(
            dimension_semantics=("parallel",),   # shard batch tiles across TCs on v7x
        ),
    )(scales, observations, w1, b1, w2, b2, w3, b3, eps)

    action = out[:B, :A]
    log_prob = out[:B, A]
    return action, log_prob


def init_params(key, obs_dim, action_dim, hidden_sizes,
                log_std_multiplier=1.0, log_std_offset=-1.0):
    """Deterministic init matching nn.Linear's default U(-1/sqrt(fan_in), 1/sqrt(fan_in))."""
    def linear(key, d_in, d_out):
        kw, kb = jax.random.split(key)
        bound = 1.0 / math.sqrt(d_in)
        w = jax.random.uniform(kw, (d_in, d_out), jnp.float32, -bound, bound)
        b = jax.random.uniform(kb, (1, d_out), jnp.float32, -bound, bound)
        return w, b

    k1, k2, k3 = jax.random.split(key, 3)
    h1, h2 = hidden_sizes
    w1, b1 = linear(k1, obs_dim, h1)
    w2, b2 = linear(k2, h1, h2)
    w3, b3 = linear(k3, h2, 2 * action_dim)   # fused [mean | log_std] head
    return {
        "w1": w1, "b1": b1,
        "w2": w2, "b2": b2,
        "w3": w3, "b3": b3,
        "scales": jnp.array([log_std_multiplier, log_std_offset], jnp.float32),
    }


def _reference_forward(observations, params, eps):
    """Pure-JAX reference of the same math (for sanity checking)."""
    A = params["w3"].shape[1] // 2
    h = jnp.maximum(observations @ params["w1"] + params["b1"], 0.0)
    h = jnp.maximum(h @ params["w2"] + params["b2"], 0.0)
    heads = h @ params["w3"] + params["b3"]
    mean, log_std = heads[:, :A], heads[:, A:]
    log_std = params["scales"][0] * log_std + params["scales"][1]
    log_std = jnp.clip(log_std, -20.0, 2.0)
    std = jnp.exp(log_std)
    z = mean + std * eps
    action = jnp.tanh(z)
    normal_lp = -0.5 * ((z - mean) / std) ** 2 - log_std - 0.5 * jnp.log(2.0 * jnp.pi)
    log_det = 2.0 * (jnp.log(2.0) - z - jax.nn.softplus(-2.0 * z))
    return action, jnp.sum(normal_lp - log_det, axis=-1)


if __name__ == "__main__":
    # Small shapes consistent with the module: arch "32-32", obs_dim=16, action_dim=8.
    OBS, ACT = 16, 8
    HIDDEN = (32, 32)

    key = jax.random.PRNGKey(0)
    k_params, k_obs, k_eps, k_obs2, k_eps2 = jax.random.split(key, 5)
    params = init_params(k_params, OBS, ACT, HIDDEN,
                         log_std_multiplier=1.0, log_std_offset=-1.0)

    # --- case 1: tiny batch (single tile path) ---
    B = 8
    observations = jax.random.normal(k_obs, (B, OBS), jnp.float32)
    eps = jax.random.normal(k_eps, (B, ACT), jnp.float32)
    action, log_prob = tanh_gaussian_policy_forward(observations, params, eps,
                                                    deterministic=False)
    jax.block_until_ready((action, log_prob))
    ref_action, ref_lp = _reference_forward(observations, params, eps)
    assert jnp.allclose(action, ref_action, atol=1e-5, rtol=1e-5)
    assert jnp.allclose(log_prob, ref_lp, atol=1e-4, rtol=1e-4)

    # --- case 2: multi-tile grid + tail padding (B not a multiple of the tile) ---
    B2 = 300
    observations2 = jax.random.normal(k_obs2, (B2, OBS), jnp.float32)
    eps2 = jax.random.normal(k_eps2, (B2, ACT), jnp.float32)
    action2, log_prob2 = tanh_gaussian_policy_forward(observations2, params, eps2,
                                                      deterministic=False, block_b=128)
    jax.block_until_ready((action2, log_prob2))
    ref_action2, ref_lp2 = _reference_forward(observations2, params, eps2)
    assert jnp.allclose(action2, ref_action2, atol=1e-5, rtol=1e-5)
    assert jnp.allclose(log_prob2, ref_lp2, atol=1e-4, rtol=1e-4)

    # deterministic path: z = mean, action = tanh(mean)
    det_action, _ = tanh_gaussian_policy_forward(observations, params, eps,
                                                 deterministic=True)
    det_ref, _ = _reference_forward(observations, params, jnp.zeros_like(eps))
    assert jnp.allclose(det_action, det_ref, atol=1e-5, rtol=1e-5)

    print("KERNEL_OK")
</pallas_src>

<mosaic_0001>
module attributes {stable_mosaic.version = 11 : i64} {
  func.func @_policy_kernel(%arg0: i32, %arg1: memref<2xf32, #tpu.memory_space<smem>>, %arg2: memref<8x16xf32, #tpu.memory_space<vmem>>, %arg3: memref<16x32xf32, #tpu.memory_space<vmem>>, %arg4: memref<1x32xf32, #tpu.memory_space<vmem>>, %arg5: memref<32x32xf32, #tpu.memory_space<vmem>>, %arg6: memref<1x32xf32, #tpu.memory_space<vmem>>, %arg7: memref<32x16xf32, #tpu.memory_space<vmem>>, %arg8: memref<1x16xf32, #tpu.memory_space<vmem>>, %arg9: memref<8x8xf32, #tpu.memory_space<vmem>>, %arg10: memref<8x9xf32, #tpu.memory_space<vmem>>) attributes {dimension_semantics = [#tpu.dimension_semantics<parallel>], iteration_bounds = array<i64: 1>, scalar_prefetch = 1 : i64, scratch_operands = 0 : i64, tpu.core_type = #tpu.core_type<tc>, window_params = [{transform_indices = @transform_0, window_bounds = array<i64: 8, 16>}, {pipeline_mode = #tpu.pipeline_mode<synchronous>, transform_indices = @transform_1, window_bounds = array<i64: 16, 32>}, {pipeline_mode = #tpu.pipeline_mode<synchronous>, transform_indices = @transform_2, window_bounds = array<i64: 1, 32>}, {pipeline_mode = #tpu.pipeline_mode<synchronous>, transform_indices = @transform_3, window_bounds = array<i64: 32, 32>}, {pipeline_mode = #tpu.pipeline_mode<synchronous>, transform_indices = @transform_4, window_bounds = array<i64: 1, 32>}, {pipeline_mode = #tpu.pipeline_mode<synchronous>, transform_indices = @transform_5, window_bounds = array<i64: 32, 16>}, {pipeline_mode = #tpu.pipeline_mode<synchronous>, transform_indices = @transform_6, window_bounds = array<i64: 1, 16>}, {transform_indices = @transform_7, window_bounds = array<i64: 8, 8>}, {transform_indices = @transform_8, window_bounds = array<i64: 8, 9>}]} {
    %c0 = arith.constant 0 : index
    %c0_0 = arith.constant 0 : index
    %0 = vector.load %arg2[%c0, %c0_0] : memref<8x16xf32, #tpu.memory_space<vmem>>, vector<8x16xf32>
    %c0_1 = arith.constant 0 : index
    %c0_2 = arith.constant 0 : index
    %1 = vector.load %arg3[%c0_1, %c0_2] : memref<16x32xf32, #tpu.memory_space<vmem>>, vector<16x32xf32>
    %cst = arith.constant dense<0.000000e+00> : vector<8x32xf32>
    %2 = tpu.matmul %0, %1, %cst {dimension_numbers = #tpu.dot_dimension_numbers<[1], [0], [0], [1], [0, 0, 1, 1], [], []>} : vector<8x16xf32>, vector<16x32xf32>, vector<8x32xf32> -> vector<8x32xf32>
    %c0_3 = arith.constant 0 : index
    %c0_4 = arith.constant 0 : index
    %3 = vector.load %arg4[%c0_3, %c0_4] : memref<1x32xf32, #tpu.memory_space<vmem>>, vector<1x32xf32>
    %4 = vector.broadcast %3 : vector<1x32xf32> to vector<8x32xf32>
    %5 = arith.addf %2, %4 : vector<8x32xf32>
    %cst_5 = arith.constant 0.000000e+00 : f32
    %6 = vector.broadcast %cst_5 : f32 to vector<8x32xf32>
    %7 = arith.maximumf %5, %6 : vector<8x32xf32>
    %c0_6 = arith.constant 0 : index
    %c0_7 = arith.constant 0 : index
    %8 = vector.load %arg5[%c0_6, %c0_7] : memref<32x32xf32, #tpu.memory_space<vmem>>, vector<32x32xf32>
    %cst_8 = arith.constant dense<0.000000e+00> : vector<8x32xf32>
    %9 = tpu.matmul %7, %8, %cst_8 {dimension_numbers = #tpu.dot_dimension_numbers<[1], [0], [0], [1], [0, 0, 1, 1], [], []>} : vector<8x32xf32>, vector<32x32xf32>, vector<8x32xf32> -> vector<8x32xf32>
    %c0_9 = arith.constant 0 : index
    %c0_10 = arith.constant 0 : index
    %10 = vector.load %arg6[%c0_9, %c0_10] : memref<1x32xf32, #tpu.memory_space<vmem>>, vector<1x32xf32>
    %11 = vector.broadcast %10 : vector<1x32xf32> to vector<8x32xf32>
    %12 = arith.addf %9, %11 : vector<8x32xf32>
    %cst_11 = arith.constant 0.000000e+00 : f32
    %13 = vector.broadcast %cst_11 : f32 to vector<8x32xf32>
    %14 = arith.maximumf %12, %13 : vector<8x32xf32>
    %c0_12 = arith.constant 0 : index
    %c0_13 = arith.constant 0 : index
    %15 = vector.load %arg7[%c0_12, %c0_13] : memref<32x16xf32, #tpu.memory_space<vmem>>, vector<32x16xf32>
    %cst_14 = arith.constant dense<0.000000e+00> : vector<8x16xf32>
    %16 = tpu.matmul %14, %15, %cst_14 {dimension_numbers = #tpu.dot_dimension_numbers<[1], [0], [0], [1], [0, 0, 1, 1], [], []>} : vector<8x32xf32>, vector<32x16xf32>, vector<8x16xf32> -> vector<8x16xf32>
    %c0_15 = arith.constant 0 : index
    %c0_16 = arith.constant 0 : index
    %17 = vector.load %arg8[%c0_15, %c0_16] : memref<1x16xf32, #tpu.memory_space<vmem>>, vector<1x16xf32>
    %18 = vector.broadcast %17 : vector<1x16xf32> to vector<8x16xf32>
    %19 = arith.addf %16, %18 : vector<8x16xf32>
    %20 = vector.extract_strided_slice %19 {offsets = [0, 0], sizes = [8, 8], strides = [1, 1]} : vector<8x16xf32> to vector<8x8xf32>
    %21 = vector.extract_strided_slice %19 {offsets = [0, 8], sizes = [8, 8], strides = [1, 1]} : vector<8x16xf32> to vector<8x8xf32>
    %c0_17 = arith.constant 0 : index
    %22 = memref.load %arg1[%c0_17] : memref<2xf32, #tpu.memory_space<smem>>
    %c1 = arith.constant 1 : index
    %23 = memref.load %arg1[%c1] : memref<2xf32, #tpu.memory_space<smem>>
    %24 = vector.broadcast %22 : f32 to vector<8x8xf32>
    %25 = arith.mulf %24, %21 : vector<8x8xf32>
    %26 = vector.broadcast %23 : f32 to vector<8x8xf32>
    %27 = arith.addf %25, %26 : vector<8x8xf32>
    %cst_18 = arith.constant -2.000000e+01 : f32
    %cst_19 = arith.constant 2.000000e+00 : f32
    %28 = vector.broadcast %cst_18 : f32 to vector<8x8xf32>
    %29 = arith.maximumf %28, %27 : vector<8x8xf32>
    %30 = vector.broadcast %cst_19 : f32 to vector<8x8xf32>
    %31 = arith.minimumf %30, %29 : vector<8x8xf32>
    %32 = math.exp %31 : vector<8x8xf32>
    %c0_20 = arith.constant 0 : index
    %c0_21 = arith.constant 0 : index
    %33 = vector.load %arg9[%c0_20, %c0_21] : memref<8x8xf32, #tpu.memory_space<vmem>>, vector<8x8xf32>
    %34 = arith.mulf %32, %33 : vector<8x8xf32>
    %35 = arith.addf %20, %34 : vector<8x8xf32>
    %36 = math.tanh %35 : vector<8x8xf32>
    %37 = arith.mulf %33, %33 : vector<8x8xf32>
    %cst_22 = arith.constant -5.000000e-01 : f32
    %38 = vector.broadcast %cst_22 : f32 to vector<8x8xf32>
    %39 = arith.mulf %38, %37 : vector<8x8xf32>
    %40 = arith.subf %39, %31 : vector<8x8xf32>
    %cst_23 = arith.constant 0.918938517 : f32
    %41 = vector.broadcast %cst_23 : f32 to vector<8x8xf32>
    %42 = arith.subf %40, %41 : vector<8x8xf32>
    %43 = math.absf %35 : vector<8x8xf32>
    %cst_24 = arith.constant -2.000000e+00 : f32
    %44 = vector.broadcast %cst_24 : f32 to vector<8x8xf32>
    %45 = arith.mulf %44, %43 : vector<8x8xf32>
    %46 = math.exp %45 : vector<8x8xf32>
    %47 = math.log1p %46 : vector<8x8xf32>
    %cst_25 = arith.constant -2.000000e+00 : f32
    %48 = vector.broadcast %cst_25 : f32 to vector<8x8xf32>
    %49 = arith.mulf %48, %35 : vector<8x8xf32>
    %cst_26 = arith.constant 0.000000e+00 : f32
    %50 = vector.broadcast %cst_26 : f32 to vector<8x8xf32>
    %51 = arith.maximumf %49, %50 : vector<8x8xf32>
    %52 = arith.addf %47, %51 : vector<8x8xf32>
    %cst_27 = arith.constant 0.693147182 : f32
    %53 = vector.broadcast %cst_27 : f32 to vector<8x8xf32>
    %54 = arith.subf %53, %35 : vector<8x8xf32>
    %55 = arith.subf %54, %52 : vector<8x8xf32>
    %cst_28 = arith.constant 2.000000e+00 : f32
    %56 = vector.broadcast %cst_28 : f32 to vector<8x8xf32>
    %57 = arith.mulf %56, %55 : vector<8x8xf32>
    %58 = arith.subf %42, %57 : vector<8x8xf32>
    %cst_29 = arith.constant dense<0.000000e+00> : vector<8xf32>
    %59 = vector.multi_reduction <add>, %58, %cst_29 [1] : vector<8x8xf32> to vector<8xf32>
    %60 = vector.shape_cast %59 : vector<8xf32> to vector<8x1xf32>
    %61 = tpu.concatenate %36, %60 in 1 : vector<8x8xf32>, vector<8x1xf32> -> vector<8x9xf32>
    %c0_30 = arith.constant 0 : index
    %c0_31 = arith.constant 0 : index
    %62 = vector.load %arg10[%c0_30, %c0_31] : memref<8x9xf32, #tpu.memory_space<vmem>>, vector<8x9xf32>
    tpu.vector_store %arg10[%c0_30, %c0_31], %61 {strides = array<i32>} : memref<8x9xf32, #tpu.memory_space<vmem>>, vector<8x9xf32>,
    return
  }
  func.func @transform_0(%arg0: i32, %arg1: memref<2xf32, #tpu.memory_space<smem>>) -> (i32, i32) {
    %c0_i32 = arith.constant 0 : i32
    %c0_i32_0 = arith.constant 0 : i32
    return %arg0, %c0_i32 : i32, i32
  }
  func.func @transform_1(%arg0: i32, %arg1: memref<2xf32, #tpu.memory_space<smem>>) -> (i32, i32) {
    %c0_i32 = arith.constant 0 : i32
    %c0_i32_0 = arith.constant 0 : i32
    %c0_i32_1 = arith.constant 0 : i32
    return %c0_i32, %c0_i32_0 : i32, i32
  }
  func.func @transform_2(%arg0: i32, %arg1: memref<2xf32, #tpu.memory_space<smem>>) -> (i32, i32) {
    %c0_i32 = arith.constant 0 : i32
    %c0_i32_0 = arith.constant 0 : i32
    %c0_i32_1 = arith.constant 0 : i32
    return %c0_i32, %c0_i32_0 : i32, i32
  }
  func.func @transform_3(%arg0: i32, %arg1: memref<2xf32, #tpu.memory_space<smem>>) -> (i32, i32) {
    %c0_i32 = arith.constant 0 : i32
    %c0_i32_0 = arith.constant 0 : i32
    %c0_i32_1 = arith.constant 0 : i32
    return %c0_i32, %c0_i32_0 : i32, i32
  }
  func.func @transform_4(%arg0: i32, %arg1: memref<2xf32, #tpu.memory_space<smem>>) -> (i32, i32) {
    %c0_i32 = arith.constant 0 : i32
    %c0_i32_0 = arith.constant 0 : i32
    %c0_i32_1 = arith.constant 0 : i32
    return %c0_i32, %c0_i32_0 : i32, i32
  }
  func.func @transform_5(%arg0: i32, %arg1: memref<2xf32, #tpu.memory_space<smem>>) -> (i32, i32) {
    %c0_i32 = arith.constant 0 : i32
    %c0_i32_0 = arith.constant 0 : i32
    %c0_i32_1 = arith.constant 0 : i32
    return %c0_i32, %c0_i32_0 : i32, i32
  }
  func.func @transform_6(%arg0: i32, %arg1: memref<2xf32, #tpu.memory_space<smem>>) -> (i32, i32) {
    %c0_i32 = arith.constant 0 : i32
    %c0_i32_0 = arith.constant 0 : i32
    %c0_i32_1 = arith.constant 0 : i32
    return %c0_i32, %c0_i32_0 : i32, i32
  }
  func.func @transform_7(%arg0: i32, %arg1: memref<2xf32, #tpu.memory_space<smem>>) -> (i32, i32) {
    %c0_i32 = arith.constant 0 : i32
    %c0_i32_0 = arith.constant 0 : i32
    return %arg0, %c0_i32 : i32, i32
  }
  func.func @transform_8(%arg0: i32, %arg1: memref<2xf32, #tpu.memory_space<smem>>) -> (i32, i32) {
    %c0_i32 = arith.constant 0 : i32
    %c0_i32_0 = arith.constant 0 : i32
    return %arg0, %c0_i32 : i32, i32
  }
}

</mosaic_0001>

<bundles_post_ra>
// kernel: tpu_custom_call.1
= control target key start
LH: loop header
LB: loop body
LE: loop exit
PB: predicated region body
PF: predicated region fallthrough
CT: control target
= control target key end

     0   :  { %s741_s0 = inlined_call_operand.vmem [shape: f32[2], index: 0, kind: input, shape index: {}]   ;;  %s742_s1 = inlined_call_operand.hbm [shape: f32[8,16], index: 1, kind: input, shape index: {}]   ;;  %s743_s2 = inlined_call_operand.vmem [shape: f32[16,32], index: 2, kind: input, shape index: {}]   ;;  %s744_s3 = inlined_call_operand.vmem [shape: f32[1,32], index: 3, kind: input, shape index: {}]   ;;  %s745_s4 = inlined_call_operand.vmem [shape: f32[32,32], index: 4, kind: input, shape index: {}]   ;;  %s746_s5 = inlined_call_operand.hbm [shape: f32[1,32], index: 5, kind: input, shape index: {}]   ;;  %s747_s6 = inlined_call_operand.vmem [shape: f32[32,16], index: 6, kind: input, shape index: {}]   ;;  %s748_s7 = inlined_call_operand.hbm [shape: f32[1,16], index: 7, kind: input, shape index: {}]   ;;  %s749_s8 = inlined_call_operand.vmem [shape: f32[8,8], index: 8, kind: input, shape index: {}]   ;;  %s750_s9 = inlined_call_operand.hbm [shape: f32[8,9], index: 9, kind: output, shape index: {}]  }
   0x1   :  { %s14_s11 = sshll.u32 %s741_s0, 4  ;;  %s15_s11 = int_to_ptr.vmem [resolvable:$true] %s14_s11 }
   0x2   :  { %s483_s12 = scalar_lea.vmem %s15_s11, 16  ;;  %p488_p1 = scmp.lt.s32.totalorder %s15_s11, %s15_s11 }
   0x3   :  { %p484_p0 = scmp.ne.s32.totalorder %s15_s11, %s483_s12  ;;  %p489_p2 = scmp.lt.s32.totalorder %s483_s12, %s483_s12 }
   0x5   :  { %p490_p3 = por %p489_p2, %p488_p1 }
   0x7   :  { %p491_p4 = pnand %p490_p3, %p484_p0 }
   0x9   :  { %494 = shalt.err (!%p491_p4)  }
   0xa   :  { %s591_s13 = smov [#allocation3]  }
   0xb   :  { %17 = dma.vmem_to_smem %s15_s11, 16, %s591_s13, [#allocation2] }
   0xc   :  { %583 = dma.done.wait [#allocation2], 16 }
   0xd   :  { %584 = vsyncadd [#allocation2], 4294967280 }
   0xe   :  { %19 = sfence }
   0xf   :  { %20 = vsyncpa [#allocation5], 0 }
  0x10   :  { %21 = vsyncpa [#allocation8], 0 }
  0x11   :  { %22 = vsyncpa [#allocation6], 0  ;;  %s592_s14 = smov [#allocation7]   ;;  %s593_s16 = smov [#allocation4]  }
  0x12   :  { %s45_s15 = sshll.u32 %s592_s14, 4  ;;  %s29_s0 = sshll.u32 %s593_s16, 4  ;;  %s46_s15 = int_to_ptr.vmem [resolvable:$true] %s45_s15  ;;  %s30_s0 = int_to_ptr.vmem [resolvable:$true] %s29_s0 }
  0x13   :  { %s495_s19 = scalar_lea.hbm %s746_s5, 16 }
  0x14   :  { %p496_p5 = scmp.ne.s32.totalorder %s746_s5, %s495_s19  ;;  %p499_p6 = scmp.lt.u32.totalorder %s495_s19, %s746_s5 }
  0x16   :  { %p501_p7 = pnand %p499_p6, %p496_p5 }
  0x18   :  { %504 = shalt.err (!%p501_p7)
}
  0x19   :  { %s505_s24 = scalar_lea.vmem %s46_s15, 16  ;;  %s509_s25 = scalar_lea.vmem %s46_s15, 32 }
  0x1a   :  { %p506_p8 = scmp.ne.s32.totalorder %s46_s15, %s505_s24  ;;  %p510_p9 = scmp.lt.s32.totalorder %s46_s15, %s46_s15 }
  0x1b   :  { %p511_p10 = scmp.lt.s32.totalorder %s509_s25, %s505_s24 }
  0x1d   :  { %p512_p11 = por %p511_p10, %p510_p9 }
  0x1f   :  { %p513_p12 = pnand %p512_p11, %p506_p8 }
  0x21   :  { %516 = shalt.err (!%p513_p12)
}
  0x22   :  { %48 = dma.hbm_to_vmem [thread:$0]  %s746_s5, 16, %s46_s15, [#allocation8]  }
  0x23   :  { %s517_s30 = scalar_lea.hbm %s742_s1, 128 }
  0x24   :  { %p518_p13 = scmp.ne.s32.totalorder %s742_s1, %s517_s30  ;;  %p521_p0 = scmp.lt.u32.totalorder %s517_s30, %s742_s1 }
  0x26   :  { %p523_p1 = pnand %p521_p0, %p518_p13 }
  0x28   :  { %526 = shalt.err (!%p523_p1)
}
  0x29   :  { %s527_s14 = scalar_lea.vmem %s30_s0, 128  ;;  %p532_p3 = scmp.lt.s32.totalorder %s30_s0, %s30_s0 }
  0x2a   :  { %p528_p2 = scmp.ne.s32.totalorder %s30_s0, %s527_s14  ;;  %p533_p4 = scmp.lt.s32.totalorder %s527_s14, %s527_s14 }
  0x2c   :  { %p534_p5 = por %p533_p4, %p532_p3 }
  0x2e   :  { %p535_p6 = pnand %p534_p5, %p528_p2 }
  0x30   :  { %538 = shalt.err (!%p535_p6)
}
  0x31   :  { %32 = dma.hbm_to_vmem [thread:$0]  %s742_s1, 128, %s30_s0, [#allocation5]  }
  0x32   :  { %s594_s16 = smov [#allocation9]   ;;  %s539_s20 = scalar_lea.hbm %s748_s7, 16 }
  0x33   :  { %s57_s17 = sshll.u32 %s594_s16, 4  ;;  %p540_p7 = scmp.ne.s32.totalorder %s748_s7, %s539_s20  ;;  %s58_s17 = int_to_ptr.vmem [resolvable:$true] %s57_s17 }
  0x34   :  { %p543_p8 = scmp.lt.u32.totalorder %s539_s20, %s748_s7 }
  0x36   :  { %p545_p9 = pnand %p543_p8, %p540_p7 }
  0x38   :  { %548 = shalt.err (!%p545_p9)
}
  0x39   :  { %s549_s25 = scalar_lea.vmem %s58_s17, 16  ;;  %s553_s1 = scalar_lea.vmem %s58_s17, 32 }
  0x3a   :  { %p550_p10 = scmp.ne.s32.totalorder %s58_s17, %s549_s25  ;;  %p554_p11 = scmp.lt.s32.totalorder %s58_s17, %s58_s17 }
  0x3b   :  { %p555_p12 = scmp.lt.s32.totalorder %s553_s1, %s549_s25 }
  0x3d   :  { %p556_p13 = por %p555_p12, %p554_p11 }
  0x3f   :  { %p557_p0 = pnand %p556_p13, %p550_p10 }
  0x41   :  { %560 = shalt.err (!%p557_p0)
}
  0x42   :  { %60 = dma.hbm_to_vmem [thread:$0]  %s748_s7, 16, %s58_s17, [#allocation8]  }
  0x43   :  { %585 = dma.done.wait [#allocation5], 128  }
  0x44   :  { %586 = vsyncadd [#allocation5], 4294967168 }
  0x45   :  { %587 = dma.done.wait [#allocation8], 32  }
  0x46   :  { %588 = vsyncadd [#allocation8], 4294967264  ;;  %v595_v0 = vmov 0.0|0.0   ;;  %vm596_vm0 = vmmov 0   ;;  %v597_v1 = vmov 0.0   ;;  %v73_v2 = vld [vmem:[%s743_s2] sm:$0xff] }
  0x47   :  { %450 = vmatprep.subr.bf16.mxu0 %v595_v0  ;;  %425 = vmatprep.mubr.msk.f32.mxu0 %vm596_vm0, %v597_v1  ;;  %v74_v3 = vld [vmem:[%s743_s2 + $0x8] sm:$0xff]  ;;  %v157_v5 = vld [vmem:[%s745_s4] sm:$0xff]  ;;  %vm82_vm1 = vcmask 130048   ;;  %v159_v9 = vld [vmem:[%s745_s4 + $0x10] sm:$0xff]  ;;  %vm168_vm2 = vcmask 261120   ;;  %s327_s1 = sld [smem:[#allocation3]] }
  0x48   :  { %453 = vmatprep.subr.bf16.mxu1 %v595_v0  ;;  %436 = vmatprep.mubr.msk.f32.mxu1 %vm596_vm0, %v597_v1  ;;  %v451_v4 = vpack.c.bf16 %v74_v3, %v73_v2  ;;  %v158_v6 = vld [vmem:[%s745_s4 + $0x8] sm:$0xff]  ;;  %v72_v8 = vld [vmem:[#allocation4] sm:$0xff]  ;;  %v160_v10 = vld [vmem:[%s745_s4 + $0x18] sm:$0xff]  ;;  %s406_s0 = sld [smem:[#allocation3 + $0x1]]  ;;  %vm377_vm4 = vcmask 64512   ;;  %vm382_vm5 = vcmask 72704  }
  0x49   :  { %v454_v7 = vpack.c.bf16 %v158_v6, %v157_v5  ;;  %v457_v11 = vpack.c.bf16 %v160_v10, %v159_v9  ;;  %v243_v12 = vld [vmem:[%s747_s6] sm:$0xff]  ;;  %v244_v13 = vld [vmem:[%s747_s6 + $0x8] sm:$0xff]  ;;  %v245_v20 = vld [vmem:[%s747_s6 + $0x10] sm:$0xff] }
  0x4a   :  { %452 = vmatpush3.bf16.msra.mxu0 %v451_v4  ;;  %v460_v14 = vpack.c.bf16 %v244_v13, %v243_v12  ;;  %v400_v15 = vld [vmem:[%s744_s3] ss:$0 sm:$0xff]  ;;  %v246_v21 = vld [vmem:[%s747_s6 + $0x18] sm:$0xff]  ;;  %s598_s3 = smov 8   ;;  %v402_v24 = vld [vmem:[#allocation7] ss:$0 sm:$0xff] }
  0x4b   :  { %455 = vmatpush3.bf16.msra.mxu1 %v454_v7  ;;  %459 = vmatprep.subr.bf16.mxu0 %v595_v0  ;;  %v463_v22 = vpack.c.bf16 %v246_v21, %v245_v20  ;;  %v337_v23 = vld [vmem:[%s749_s8] sm:$0xff]  ;;  %v404_v29 = vld [vmem:[#allocation9] ss:$0 sm:$0xff]  ;;  %s599_s6 = smov 120   ;;  %s600_s8 = smov [#allocation10]  }
  0x4c   :  { %456 = vmatprep.subr.bf16.mxu1 %v595_v0  ;;  %339 = vrot.lane.b32.xlu0 %v337_v23, %s598_s3  ;;  %v349_v51 = vmul.f32 %v337_v23, %v337_v23  ;;  %s390_s26 = sshll.u32 %s600_s8, 4  ;;  %s391_s26 = int_to_ptr.vmem [resolvable:$true] %s390_s26 }
  0x4d   :  { %426 = vmatmul.mubr.msk.f32.vlgmr.msra.gmra.mrb[0].mxu0 %vm82_vm1, %v72_v8  ;;  %v329_v31 = vstv %s327_s1  ;;  %s561_s27 = scalar_lea.vmem %s391_s26, 128  ;;  %p566_p2 = scmp.lt.s32.totalorder %s391_s26, %s391_s26 }
  0x4e   :  { %447 = vmatprep.mubr.msk.f32.mxu0 %vm596_vm0, %v597_v1  ;;  %461 = vmatpush3.bf16.msra.mxu0 %v460_v14  ;;  %v331_v34 = vstv %s406_s0  ;;  %v350_v56 = vmul.f32 -0.5, %v349_v51  ;;  %p562_p1 = scmp.ne.s32.totalorder %s391_s26, %s561_s27  ;;  %p567_p3 = scmp.lt.s32.totalorder %s561_s27, %s561_s27 }
  0x4f   :  { %458 = vmatpush3.bf16.msra.mxu1 %v457_v11  ;;  %462 = vmatprep.subr.bf16.mxu0 %v595_v0 }
  0x50   :  { %p568_p4 = por %p567_p3, %p566_p2 }
  0x52   :  { %464 = vmatpush3.bf16.msra.mxu0 %v463_v22  ;;  %p569_p5 = pnand %p568_p4, %p562_p1 }
  0xbe   :  { %v340_v40 = vpop.permute.xlu0 %339 }
 0x120   :  { %v152_v16 = vpop.f32.mrb[0].mxu0 }
 0x121   :  { %v153_v17 = vadd.f32 %v400_v15, %v152_v16  ;;  %v427_v18 = vpop.f32.mrb[1].mxu0 }
 0x123   :  { %v156_v19 = vmax.f32 %v153_v17, 0.0 }
 0x125   :  { %437 = vmatmul.mubr.msk.f32.vlgmr.msra.gmra.mrb[0].mxu1 %vm168_vm2, %v156_v19 }
 0x1f8   :  { %v238_v25 = vpop.f32.mrb[0].mxu1 }
 0x1f9   :  { %v239_v26 = vadd.f32 %v402_v24, %v238_v25  ;;  %v438_v27 = vpop.f32.mrb[1].mxu1 }
 0x1fb   :  { %v242_v28 = vmax.f32 %v239_v26, 0.0 }
 0x1fd   :  { %448 = vmatmul.mubr.msk.f32.vlgmr.msra.gmra.mrb[2].mxu0 %vm168_vm2, %v242_v28 }
 0x2d0   :  { %v323_v30 = vpop.f32.mrb[2].mxu0 }
 0x2d1   :  { %v324_v32 = vadd.f32 %v404_v29, %v323_v30  ;;  %v449_v33 = vpop.f32.mrb[3].mxu0 }
 0x2d3   :  { %v330_v35 = vmul.f32 %v329_v31, %v324_v32 }
 0x2d5   :  { %v332_v36 = vadd.f32 %v331_v34, %v330_v35 }
 0x2d7   :  { %v333_v37 = vmax.f32 %v332_v36, -20.0 }
 0x2d9   :  { %v334_v38 = vmin.f32 %v333_v37, 2.0 }
 0x2db   :  { %352 = vrot.lane.b32.xlu1 %v334_v38, %s599_s6  ;;  %v335_v39 = vmul.f32 1.442695, %v334_v38 }
 0x2dd   :  { %475 = vpow2.f32 %v335_v39 }
 0x2e7   :  { %v476_v41 = vpop.eup %475 }
 0x2e8   :  { %v342_v42 = vmul.f32 %v476_v41, %v340_v40 }
 0x2ea   :  { %344 = vrot.lane.b32.xlu0 %v342_v42, %s599_s6 }
 0x34d   :  { %v353_v57 = vpop.permute.xlu1 %352 }
 0x34e   :  { %v355_v62 = vsub.f32 %v350_v56, %v353_v57 }
 0x350   :  { %v407_v2 = vadd.f32 -0.9189385, %v355_v62 }
 0x35c   :  { %v345_v43 = vpop.permute.xlu0 %344 }
 0x35d   :  { %v347_v44 = vadd.f32 %v345_v43, %v324_v32 }
 0x35f   :  { %v357_v45 = vand.u32 2147483647, %v347_v44  ;;  %v370_v53 = vmul.f32 -2.0, %v347_v44  ;;  %v373_v0 = vsub.f32 0.6931472, %v347_v44 }
 0x361   :  { %v358_v46 = vmul.f32 -2.0, %v357_v45  ;;  %v371_v60 = vmax.f32 %v370_v53, 0.0 }
 0x363   :  { %v359_v47 = vmul.f32 1.442695, %v358_v46 }
 0x365   :  { %477 = vpow2.f32 %v359_v47 }
 0x36f   :  { %v478_v48 = vpop.eup %477 }
 0x370   :  { %v361_v49 = vadd.f32 1.0, %v478_v48  ;;  %v364_v50 = vmul.f32 -0.5, %v478_v48  ;;  %v367_v54 = vand.u32 2147483647, %v478_v48 }
 0x372   :  { %479 = vlog2.f32 %v361_v49  ;;  %v365_v52 = vadd.f32 1.0, %v364_v50  ;;  %vm368_vm3 = vcmp.lt.f32.partialorder %v367_v54, 0.0004427343 }
 0x373   :  { %481 = vtanh.f32 %v347_v44 }
 0x374   :  { %v366_v59 = vmul.f32 %v478_v48, %v365_v52 }
 0x37c   :  { %v480_v55 = vpop.eup %479 }
 0x37d   :  { %v363_v58 = vmul.f32 0.6931472, %v480_v55  ;;  %v482_v6 = vpop.eup %481 }
 0x37f   :  { %v369_v61 = vsel %vm368_vm3, %v366_v59, %v363_v58 }
 0x380   :  { %v372_v63 = vadd.f32 %v371_v60, %v369_v61 }
 0x382   :  { %v374_v1 = vsub.f32 %v373_v0, %v372_v63 }
 0x384   :  { %v375_v3 = vmul.f32 2.0, %v374_v1 }
 0x386   :  { %v376_v4 = vsub.f32 %v407_v2, %v375_v3 }
 0x388   :  { %v378_v5 = vsel %vm377_vm4, %v376_v4, 0.0 }
 0x389   :  { %379 = vadd.xlane.f32.xlu1 %v378_v5 }
 0x416   :  { %v380_v7 = vpop.xlane.xlu1 %379 }
 0x417   :  { %v381_v8 = vsel %vm377_vm4, %v482_v6, %v380_v7 }
 0x418   :  { %383 = vst.msk [vmem:[#allocation10] sm:$0xff] %vm382_vm5, %v381_v8 }
 0x419   :  { %572 = shalt.err (!%p569_p5)
}
 0x41a   :  { %s573_s30 = scalar_lea.hbm %s750_s9, 128 }
 0x41b   :  { %p574_p6 = scmp.ne.s32.totalorder %s750_s9, %s573_s30  ;;  %p577_p7 = scmp.lt.u32.totalorder %s573_s30, %s750_s9 }
 0x41d   :  { %p579_p8 = pnand %p577_p7, %p574_p6 }
 0x41f   :  { %582 = shalt.err (!%p579_p8)
}
 0x420   :  { %393 = dma.vmem_to_hbm [thread:$0]  %s391_s26, 128, %s750_s9, [#allocation6]  }
 0x421   :  { %589 = dma.done.wait [#allocation6], 128  }
 0x422   :  { %590 = vsyncadd [#allocation6], 4294967168 }
 0x423   :  { %397 = vsyncpa [#allocation5], 1 }
 0x424   :  { %398 = vsyncpa [#allocation8], 1 }
 0x425   :  { %399 = vsyncpa [#allocation6], 1 }

</bundles_post_ra>
